<compile_context>
chip_gen: v7x
topology: tpu7x:2x2x1
jax: 0.10.0
libtpu: 0.0.40
codegen_flags: <defaults>
</compile_context>

<pallas_src>
import math

import jax
import jax.numpy as jnp
from jax import lax
from jax.experimental import pallas as pl
from jax.experimental.pallas import tpu as pltpu


def _round_up(x, m):
    return ((x + m - 1) // m) * m


def _pick_time_chunk(T):
    for c in (32, 16, 8, 4, 2, 1):
        if T % c == 0:
            return c
    return 1


def _pad_gate_cols(w, H, Hp):
    """w: (..., 4H) with 4 gate blocks of width H -> (..., 4Hp), zero padded."""
    if H == Hp:
        return w
    out = jnp.zeros(w.shape[:-1] + (4 * Hp,), w.dtype)
    for k in range(4):
        out = out.at[..., k * Hp:k * Hp + H].set(w[..., k * H:(k + 1) * H])
    return out


def _make_recurrent_kernel(Tc, reverse):
    """Recurrent part only: gates = x_proj[t] + h_prev @ W_hh^T."""

    def kernel(xp_ref, h0_ref, c0_ref, whh_ref, out_ref, cn_ref, h_scr, c_scr):
        t_blk = pl.program_id(1)

        @pl.when(t_blk == 0)
        def _():
            h_scr[...] = h0_ref[...].astype(jnp.float32)
            c_scr[...] = c0_ref[...].astype(jnp.float32)

        Hp = h_scr.shape[-1]
        whh = whh_ref[...]                      # (Hp, 4Hp), constant-index block

        def step(i, carry):
            h_prev, c_prev = carry              # f32 (Bt, Hp)
            idx = (Tc - 1 - i) if reverse else i
            gates = xp_ref[idx].astype(jnp.float32) + jnp.dot(
                h_prev.astype(whh.dtype), whh,
                preferred_element_type=jnp.float32)        # (Bt, 4Hp)
            i_t = jax.nn.sigmoid(gates[:, 0 * Hp:1 * Hp])
            f_t = jax.nn.sigmoid(gates[:, 1 * Hp:2 * Hp])
            g_t = jnp.tanh(gates[:, 2 * Hp:3 * Hp])
            o_t = jax.nn.sigmoid(gates[:, 3 * Hp:4 * Hp])
            c_t = f_t * c_prev + i_t * g_t
            h_t = o_t * jnp.tanh(c_t)
            out_ref[idx] = h_t.astype(out_ref.dtype)
            return (h_t, c_t)

        h_fin, c_fin = lax.fori_loop(
            0, Tc, step, (h_scr[...], c_scr[...]), unroll=True)
        h_scr[...] = h_fin
        c_scr[...] = c_fin

        @pl.when(t_blk == pl.num_programs(1) - 1)
        def _():
            cn_ref[...] = c_fin.astype(cn_ref.dtype)

    return kernel


def dp_lstm_layer_forward(x, state_init, w_ih, w_hh, b_ih, b_hh,
                          reverse=False, dropout=0.0):
    """Forward pass of DPLSTMLayer.

    x: [T, B, D]; state_init = (h_0 [B,H], c_0 [B,H]);
    w_ih: [4H, D]; w_hh: [4H, H]; b_ih/b_hh: [4H].
    Returns (output [T, B, H], (h_n [B, H], c_n [B, H])).
    """
    # TODO(synk): training-mode nn.Dropout on h_t (dropout > 0) would need an
    # in-kernel PRNG mask (pltpu.prng_*); only dropout == 0.0 is supported.
    assert dropout == 0.0

    h0, c0 = state_init
    T, B, D = x.shape
    H = h0.shape[-1]
    out_dtype = x.dtype

    # ---- padded / tiled sizes -------------------------------------------
    Hp = _round_up(H, 128)                                 # lane-dense gates
    sub = 16 if jnp.dtype(x.dtype).itemsize == 2 else 8
    Bp = _round_up(B, sub)
    Bt = Bp if Bp <= 128 else 128
    if Bp % Bt != 0:
        Bp = _round_up(Bp, Bt)
    nb = Bp // Bt
    Tc = _pick_time_chunk(T)
    nt = T // Tc

    # ---- hoisted input projection (one big MXU matmul, off the serial path)
    wih_p = _pad_gate_cols(jnp.transpose(w_ih), H, Hp)                  # (D, 4Hp)
    bias_p = _pad_gate_cols((b_ih + b_hh).reshape(1, 4 * H), H, Hp)     # (1, 4Hp)
    xp = jnp.dot(x.reshape(T * B, D), wih_p,
                 preferred_element_type=jnp.float32)
    xp = (xp + bias_p.astype(jnp.float32)).reshape(T, B, 4 * Hp)
    xp = xp.astype(jnp.float32)
    if Bp != B:
        xp = jnp.pad(xp, ((0, 0), (0, Bp - B), (0, 0)))

    # ---- recurrent weight + initial state (padded, gate-block layout) ----
    whh_t = jnp.transpose(w_hh)                                          # (H, 4H)
    if Hp != H:
        whh_t = jnp.pad(whh_t, ((0, Hp - H), (0, 0)))
    whh_p = _pad_gate_cols(whh_t, H, Hp)                                 # (Hp, 4Hp)

    def pad_state(s):
        return jnp.pad(s, ((0, Bp - B), (0, Hp - H)))

    h0_p = pad_state(h0)
    c0_p = pad_state(c0)

    # ---- BlockSpecs (reverse folded into the time index_map) -------------
    if reverse:
        t_map = lambda b, t: (nt - 1 - t, b, 0)
    else:
        t_map = lambda b, t: (t, b, 0)

    grid = (nb, nt)
    in_specs = [
        pl.BlockSpec((Tc, Bt, 4 * Hp), t_map),               # x_proj chunk
        pl.BlockSpec((Bt, Hp), lambda b, t: (b, 0)),         # h_0
        pl.BlockSpec((Bt, Hp), lambda b, t: (b, 0)),         # c_0
        pl.BlockSpec((Hp, 4 * Hp), lambda b, t: (0, 0)),     # W_hh^T (resident)
    ]
    out_specs = (
        pl.BlockSpec((Tc, Bt, Hp), t_map),                   # per-step h_t
        pl.BlockSpec((Bt, Hp), lambda b, t: (b, 0)),         # c_n
    )
    out_shapes = (
        jax.ShapeDtypeStruct((T, Bp, Hp), out_dtype),
        jax.ShapeDtypeStruct((Bp, Hp), out_dtype),
    )

    # ---- explicit VMEM budget (double-buffered blocks + f32 state scratch)
    o_sz = jnp.dtype(out_dtype).itemsize
    w_sz = jnp.dtype(whh_p.dtype).itemsize
    est = (2 * Tc * Bt * 4 * Hp * 4          # x_proj blocks (f32)
           + 2 * Hp * 4 * Hp * w_sz          # W_hh^T blocks
           + 2 * Tc * Bt * Hp * o_sz         # output blocks
           + 4 * Bt * Hp * o_sz              # h0 / c0 blocks
           + 2 * Bt * Hp * o_sz              # c_n block
           + 2 * Bt * Hp * 4)                # h / c scratch (f32)
    vmem_limit = int(min(max(32 * 2 ** 20, 2 * est), 100 * 2 ** 20))

    out_p, cn_p = pl.pallas_call(
        _make_recurrent_kernel(Tc, reverse),
        out_shape=out_shapes,
        grid_spec=pltpu.PrefetchScalarGridSpec(
            num_scalar_prefetch=0,
            grid=grid,
            in_specs=in_specs,
            out_specs=out_specs,
            scratch_shapes=[
                pltpu.VMEM((Bt, Hp), jnp.float32),   # h state
                pltpu.VMEM((Bt, Hp), jnp.float32),   # c state
            ],
        ),
        compiler_params=pltpu.CompilerParams(
            dimension_semantics=("parallel", "arbitrary"),
            vmem_limit_bytes=vmem_limit,
        ),
    )(xp, h0_p, c0_p, whh_p)

    output = out_p[:, :B, :H]
    # h_n is the last *processed* hidden state == output row 0 (reverse) / -1.
    h_n = output[0] if reverse else output[-1]
    c_n = cn_p[:B, :H]
    return output, (h_n, c_n)


def _reference_forward(x, state_init, w_ih, w_hh, b_ih, b_hh, reverse=False):
    """Pure-JAX reference matching the PyTorch module semantics."""
    h0, c0 = state_init
    H = h0.shape[-1]
    if reverse:
        x = jnp.flip(x, axis=0)

    def step(carry, x_t):
        h_prev, c_prev = carry
        gates = x_t @ w_ih.T + b_ih + h_prev @ w_hh.T + b_hh
        i_t = jax.nn.sigmoid(gates[:, 0 * H:1 * H])
        f_t = jax.nn.sigmoid(gates[:, 1 * H:2 * H])
        g_t = jnp.tanh(gates[:, 2 * H:3 * H])
        o_t = jax.nn.sigmoid(gates[:, 3 * H:4 * H])
        c_t = f_t * c_prev + i_t * g_t
        h_t = o_t * jnp.tanh(c_t)
        return (h_t, c_t), h_t

    (h_n, c_n), hs = jax.lax.scan(step, (h0, c0), x)
    if reverse:
        hs = jnp.flip(hs, axis=0)
    return hs, (h_n, c_n)


if __name__ == "__main__":
    # Small but padding-exercising shapes: B -> 8 (sublane), H -> 128 (lane).
    T, B, D, H = 12, 6, 20, 48
    key = jax.random.PRNGKey(0)
    kx, kh, kc, k1, k2, k3, k4 = jax.random.split(key, 7)

    # uniform(-stdv, stdv) with stdv = 1/sqrt(H), as in DPLSTMCell.reset_parameters().
    stdv = 1.0 / math.sqrt(H)
    w_ih = jax.random.uniform(k1, (4 * H, D), jnp.float32, -stdv, stdv)
    w_hh = jax.random.uniform(k2, (4 * H, H), jnp.float32, -stdv, stdv)
    b_ih = jax.random.uniform(k3, (4 * H,), jnp.float32, -stdv, stdv)
    b_hh = jax.random.uniform(k4, (4 * H,), jnp.float32, -stdv, stdv)

    x = jax.random.normal(kx, (T, B, D), jnp.float32)
    h0 = jax.random.normal(kh, (B, H), jnp.float32)
    c0 = jax.random.normal(kc, (B, H), jnp.float32)

    for reverse in (False, True):
        out, (h_n, c_n) = dp_lstm_layer_forward(
            x, (h0, c0), w_ih, w_hh, b_ih, b_hh, reverse=reverse, dropout=0.0)
        jax.block_until_ready((out, h_n, c_n))

        ref_out, (ref_h, ref_c) = _reference_forward(
            x, (h0, c0), w_ih, w_hh, b_ih, b_hh, reverse=reverse)

        assert jnp.allclose(out, ref_out, atol=1e-5, rtol=1e-5)
        assert jnp.allclose(h_n, ref_h, atol=1e-5, rtol=1e-5)
        assert jnp.allclose(c_n, ref_c, atol=1e-5, rtol=1e-5)

    print("KERNEL_OK")
</pallas_src>

<mosaic_0001>
module attributes {stable_mosaic.version = 11 : i64} {
  func.func @kernel(%arg0: i32, %arg1: i32, %arg2: memref<4x8x512xf32, #tpu.memory_space<vmem>>, %arg3: memref<8x128xf32, #tpu.memory_space<vmem>>, %arg4: memref<8x128xf32, #tpu.memory_space<vmem>>, %arg5: memref<128x512xf32, #tpu.memory_space<vmem>>, %arg6: memref<4x8x128xf32, #tpu.memory_space<vmem>>, %arg7: memref<8x128xf32, #tpu.memory_space<vmem>>, %arg8: memref<8x128xf32, #tpu.memory_space<vmem>>, %arg9: memref<8x128xf32, #tpu.memory_space<vmem>>) attributes {dimension_semantics = [#tpu.dimension_semantics<parallel>, #tpu.dimension_semantics<arbitrary>], iteration_bounds = array<i64: 1, 3>, scalar_prefetch = 0 : i64, scratch_operands = 2 : i64, tpu.core_type = #tpu.core_type<tc>, window_params = [{transform_indices = @transform_0, window_bounds = array<i64: 4, 8, 512>}, {transform_indices = @transform_1, window_bounds = array<i64: 8, 128>}, {transform_indices = @transform_2, window_bounds = array<i64: 8, 128>}, {pipeline_mode = #tpu.pipeline_mode<synchronous>, transform_indices = @transform_3, window_bounds = array<i64: 128, 512>}, {transform_indices = @transform_4, window_bounds = array<i64: 4, 8, 128>}, {transform_indices = @transform_5, window_bounds = array<i64: 8, 128>}]} {
    %c0_i32 = arith.constant 0 : i32
    %0 = arith.cmpi eq, %arg1, %c0_i32 : i32
    %1 = arith.extui %0 : i1 to i32
    %c0_i32_0 = arith.constant 0 : i32
    %2 = arith.cmpi ne, %1, %c0_i32_0 : i32
    scf.if %2 {
      %c0_44 = arith.constant 0 : index
      %c0_45 = arith.constant 0 : index
      %147 = vector.load %arg3[%c0_44, %c0_45] : memref<8x128xf32, #tpu.memory_space<vmem>>, vector<8x128xf32>
      %c0_46 = arith.constant 0 : index
      %c0_47 = arith.constant 0 : index
      %148 = vector.load %arg8[%c0_46, %c0_47] : memref<8x128xf32, #tpu.memory_space<vmem>>, vector<8x128xf32>
      tpu.vector_store %arg8[%c0_46, %c0_47], %147 {strides = array<i32>} : memref<8x128xf32, #tpu.memory_space<vmem>>, vector<8x128xf32>,
      %c0_48 = arith.constant 0 : index
      %c0_49 = arith.constant 0 : index
      %149 = vector.load %arg4[%c0_48, %c0_49] : memref<8x128xf32, #tpu.memory_space<vmem>>, vector<8x128xf32>
      %c0_50 = arith.constant 0 : index
      %c0_51 = arith.constant 0 : index
      %150 = vector.load %arg9[%c0_50, %c0_51] : memref<8x128xf32, #tpu.memory_space<vmem>>, vector<8x128xf32>
      tpu.vector_store %arg9[%c0_50, %c0_51], %149 {strides = array<i32>} : memref<8x128xf32, #tpu.memory_space<vmem>>, vector<8x128xf32>,
    } else {
    }
    %c0 = arith.constant 0 : index
    %c0_1 = arith.constant 0 : index
    %3 = vector.load %arg5[%c0, %c0_1] : memref<128x512xf32, #tpu.memory_space<vmem>>, vector<128x512xf32>
    %c0_2 = arith.constant 0 : index
    %c0_3 = arith.constant 0 : index
    %4 = vector.load %arg8[%c0_2, %c0_3] : memref<8x128xf32, #tpu.memory_space<vmem>>, vector<8x128xf32>
    %c0_4 = arith.constant 0 : index
    %c0_5 = arith.constant 0 : index
    %5 = vector.load %arg9[%c0_4, %c0_5] : memref<8x128xf32, #tpu.memory_space<vmem>>, vector<8x128xf32>
    %c0_i32_6 = arith.constant 0 : i32
    %6 = arith.index_cast %c0_i32_6 : i32 to index
    %c0_7 = arith.constant 0 : index
    %c0_8 = arith.constant 0 : index
    %7 = vector.load %arg2[%6, %c0_7, %c0_8] : memref<4x8x512xf32, #tpu.memory_space<vmem>>, vector<1x8x512xf32>
    %8 = vector.shape_cast %7 : vector<1x8x512xf32> to vector<8x512xf32>
    %cst = arith.constant dense<0.000000e+00> : vector<8x512xf32>
    %9 = tpu.matmul %4, %3, %cst {dimension_numbers = #tpu.dot_dimension_numbers<[1], [0], [0], [1], [0, 0, 1, 1], [], []>} : vector<8x128xf32>, vector<128x512xf32>, vector<8x512xf32> -> vector<8x512xf32>
    %10 = arith.addf %8, %9 : vector<8x512xf32>
    %11 = vector.extract_strided_slice %10 {offsets = [0, 0], sizes = [8, 128], strides = [1, 1]} : vector<8x512xf32> to vector<8x128xf32>
    %12 = arith.negf %11 : vector<8x128xf32>
    %13 = math.exp %12 : vector<8x128xf32>
    %cst_9 = arith.constant 1.000000e+00 : f32
    %14 = vector.broadcast %cst_9 : f32 to vector<8x128xf32>
    %15 = arith.addf %14, %13 : vector<8x128xf32>
    %16 = arith.divf %14, %15 : vector<8x128xf32>
    %17 = vector.extract_strided_slice %10 {offsets = [0, 128], sizes = [8, 128], strides = [1, 1]} : vector<8x512xf32> to vector<8x128xf32>
    %18 = arith.negf %17 : vector<8x128xf32>
    %19 = math.exp %18 : vector<8x128xf32>
    %cst_10 = arith.constant 1.000000e+00 : f32
    %20 = vector.broadcast %cst_10 : f32 to vector<8x128xf32>
    %21 = arith.addf %20, %19 : vector<8x128xf32>
    %22 = arith.divf %20, %21 : vector<8x128xf32>
    %23 = vector.extract_strided_slice %10 {offsets = [0, 256], sizes = [8, 128], strides = [1, 1]} : vector<8x512xf32> to vector<8x128xf32>
    %24 = math.tanh %23 : vector<8x128xf32>
    %25 = vector.extract_strided_slice %10 {offsets = [0, 384], sizes = [8, 128], strides = [1, 1]} : vector<8x512xf32> to vector<8x128xf32>
    %26 = arith.negf %25 : vector<8x128xf32>
    %27 = math.exp %26 : vector<8x128xf32>
    %cst_11 = arith.constant 1.000000e+00 : f32
    %28 = vector.broadcast %cst_11 : f32 to vector<8x128xf32>
    %29 = arith.addf %28, %27 : vector<8x128xf32>
    %30 = arith.divf %28, %29 : vector<8x128xf32>
    %31 = arith.mulf %22, %5 : vector<8x128xf32>
    %32 = arith.mulf %16, %24 : vector<8x128xf32>
    %33 = arith.addf %31, %32 : vector<8x128xf32>
    %34 = math.tanh %33 : vector<8x128xf32>
    %35 = arith.mulf %30, %34 : vector<8x128xf32>
    %36 = arith.index_cast %c0_i32_6 : i32 to index
    %c0_12 = arith.constant 0 : index
    %c0_13 = arith.constant 0 : index
    %37 = vector.load %arg6[%36, %c0_12, %c0_13] : memref<4x8x128xf32, #tpu.memory_space<vmem>>, vector<1x8x128xf32>
    %38 = vector.shape_cast %37 : vector<1x8x128xf32> to vector<8x128xf32>
    %39 = vector.shape_cast %35 : vector<8x128xf32> to vector<1x8x128xf32>
    tpu.vector_store %arg6[%36, %c0_12, %c0_13], %39 {strides = array<i32>} : memref<4x8x128xf32, #tpu.memory_space<vmem>>, vector<1x8x128xf32>,
    %c1_i32 = arith.constant 1 : i32
    %40 = arith.index_cast %c1_i32 : i32 to index
    %c0_14 = arith.constant 0 : index
    %c0_15 = arith.constant 0 : index
    %41 = vector.load %arg2[%40, %c0_14, %c0_15] : memref<4x8x512xf32, #tpu.memory_space<vmem>>, vector<1x8x512xf32>
    %42 = vector.shape_cast %41 : vector<1x8x512xf32> to vector<8x512xf32>
    %cst_16 = arith.constant dense<0.000000e+00> : vector<8x512xf32>
    %43 = tpu.matmul %35, %3, %cst_16 {dimension_numbers = #tpu.dot_dimension_numbers<[1], [0], [0], [1], [0, 0, 1, 1], [], []>} : vector<8x128xf32>, vector<128x512xf32>, vector<8x512xf32> -> vector<8x512xf32>
    %44 = arith.addf %42, %43 : vector<8x512xf32>
    %45 = vector.extract_strided_slice %44 {offsets = [0, 0], sizes = [8, 128], strides = [1, 1]} : vector<8x512xf32> to vector<8x128xf32>
    %46 = arith.negf %45 : vector<8x128xf32>
    %47 = math.exp %46 : vector<8x128xf32>
    %cst_17 = arith.constant 1.000000e+00 : f32
    %48 = vector.broadcast %cst_17 : f32 to vector<8x128xf32>
    %49 = arith.addf %48, %47 : vector<8x128xf32>
    %50 = arith.divf %48, %49 : vector<8x128xf32>
    %51 = vector.extract_strided_slice %44 {offsets = [0, 128], sizes = [8, 128], strides = [1, 1]} : vector<8x512xf32> to vector<8x128xf32>
    %52 = arith.negf %51 : vector<8x128xf32>
    %53 = math.exp %52 : vector<8x128xf32>
    %cst_18 = arith.constant 1.000000e+00 : f32
    %54 = vector.broadcast %cst_18 : f32 to vector<8x128xf32>
    %55 = arith.addf %54, %53 : vector<8x128xf32>
    %56 = arith.divf %54, %55 : vector<8x128xf32>
    %57 = vector.extract_strided_slice %44 {offsets = [0, 256], sizes = [8, 128], strides = [1, 1]} : vector<8x512xf32> to vector<8x128xf32>
    %58 = math.tanh %57 : vector<8x128xf32>
    %59 = vector.extract_strided_slice %44 {offsets = [0, 384], sizes = [8, 128], strides = [1, 1]} : vector<8x512xf32> to vector<8x128xf32>
    %60 = arith.negf %59 : vector<8x128xf32>
    %61 = math.exp %60 : vector<8x128xf32>
    %cst_19 = arith.constant 1.000000e+00 : f32
    %62 = vector.broadcast %cst_19 : f32 to vector<8x128xf32>
    %63 = arith.addf %62, %61 : vector<8x128xf32>
    %64 = arith.divf %62, %63 : vector<8x128xf32>
    %65 = arith.mulf %56, %33 : vector<8x128xf32>
    %66 = arith.mulf %50, %58 : vector<8x128xf32>
    %67 = arith.addf %65, %66 : vector<8x128xf32>
    %68 = math.tanh %67 : vector<8x128xf32>
    %69 = arith.mulf %64, %68 : vector<8x128xf32>
    %70 = arith.index_cast %c1_i32 : i32 to index
    %c0_20 = arith.constant 0 : index
    %c0_21 = arith.constant 0 : index
    %71 = vector.load %arg6[%70, %c0_20, %c0_21] : memref<4x8x128xf32, #tpu.memory_space<vmem>>, vector<1x8x128xf32>
    %72 = vector.shape_cast %71 : vector<1x8x128xf32> to vector<8x128xf32>
    %73 = vector.shape_cast %69 : vector<8x128xf32> to vector<1x8x128xf32>
    tpu.vector_store %arg6[%70, %c0_20, %c0_21], %73 {strides = array<i32>} : memref<4x8x128xf32, #tpu.memory_space<vmem>>, vector<1x8x128xf32>,
    %c2_i32 = arith.constant 2 : i32
    %74 = arith.index_cast %c2_i32 : i32 to index
    %c0_22 = arith.constant 0 : index
    %c0_23 = arith.constant 0 : index
    %75 = vector.load %arg2[%74, %c0_22, %c0_23] : memref<4x8x512xf32, #tpu.memory_space<vmem>>, vector<1x8x512xf32>
    %76 = vector.shape_cast %75 : vector<1x8x512xf32> to vector<8x512xf32>
    %cst_24 = arith.constant dense<0.000000e+00> : vector<8x512xf32>
    %77 = tpu.matmul %69, %3, %cst_24 {dimension_numbers = #tpu.dot_dimension_numbers<[1], [0], [0], [1], [0, 0, 1, 1], [], []>} : vector<8x128xf32>, vector<128x512xf32>, vector<8x512xf32> -> vector<8x512xf32>
    %78 = arith.addf %76, %77 : vector<8x512xf32>
    %79 = vector.extract_strided_slice %78 {offsets = [0, 0], sizes = [8, 128], strides = [1, 1]} : vector<8x512xf32> to vector<8x128xf32>
    %80 = arith.negf %79 : vector<8x128xf32>
    %81 = math.exp %80 : vector<8x128xf32>
    %cst_25 = arith.constant 1.000000e+00 : f32
    %82 = vector.broadcast %cst_25 : f32 to vector<8x128xf32>
    %83 = arith.addf %82, %81 : vector<8x128xf32>
    %84 = arith.divf %82, %83 : vector<8x128xf32>
    %85 = vector.extract_strided_slice %78 {offsets = [0, 128], sizes = [8, 128], strides = [1, 1]} : vector<8x512xf32> to vector<8x128xf32>
    %86 = arith.negf %85 : vector<8x128xf32>
    %87 = math.exp %86 : vector<8x128xf32>
    %cst_26 = arith.constant 1.000000e+00 : f32
    %88 = vector.broadcast %cst_26 : f32 to vector<8x128xf32>
    %89 = arith.addf %88, %87 : vector<8x128xf32>
    %90 = arith.divf %88, %89 : vector<8x128xf32>
    %91 = vector.extract_strided_slice %78 {offsets = [0, 256], sizes = [8, 128], strides = [1, 1]} : vector<8x512xf32> to vector<8x128xf32>
    %92 = math.tanh %91 : vector<8x128xf32>
    %93 = vector.extract_strided_slice %78 {offsets = [0, 384], sizes = [8, 128], strides = [1, 1]} : vector<8x512xf32> to vector<8x128xf32>
    %94 = arith.negf %93 : vector<8x128xf32>
    %95 = math.exp %94 : vector<8x128xf32>
    %cst_27 = arith.constant 1.000000e+00 : f32
    %96 = vector.broadcast %cst_27 : f32 to vector<8x128xf32>
    %97 = arith.addf %96, %95 : vector<8x128xf32>
    %98 = arith.divf %96, %97 : vector<8x128xf32>
    %99 = arith.mulf %90, %67 : vector<8x128xf32>
    %100 = arith.mulf %84, %92 : vector<8x128xf32>
    %101 = arith.addf %99, %100 : vector<8x128xf32>
    %102 = math.tanh %101 : vector<8x128xf32>
    %103 = arith.mulf %98, %102 : vector<8x128xf32>
    %104 = arith.index_cast %c2_i32 : i32 to index
    %c0_28 = arith.constant 0 : index
    %c0_29 = arith.constant 0 : index
    %105 = vector.load %arg6[%104, %c0_28, %c0_29] : memref<4x8x128xf32, #tpu.memory_space<vmem>>, vector<1x8x128xf32>
    %106 = vector.shape_cast %105 : vector<1x8x128xf32> to vector<8x128xf32>
    %107 = vector.shape_cast %103 : vector<8x128xf32> to vector<1x8x128xf32>
    tpu.vector_store %arg6[%104, %c0_28, %c0_29], %107 {strides = array<i32>} : memref<4x8x128xf32, #tpu.memory_space<vmem>>, vector<1x8x128xf32>,
    %c3_i32 = arith.constant 3 : i32
    %108 = arith.index_cast %c3_i32 : i32 to index
    %c0_30 = arith.constant 0 : index
    %c0_31 = arith.constant 0 : index
    %109 = vector.load %arg2[%108, %c0_30, %c0_31] : memref<4x8x512xf32, #tpu.memory_space<vmem>>, vector<1x8x512xf32>
    %110 = vector.shape_cast %109 : vector<1x8x512xf32> to vector<8x512xf32>
    %cst_32 = arith.constant dense<0.000000e+00> : vector<8x512xf32>
    %111 = tpu.matmul %103, %3, %cst_32 {dimension_numbers = #tpu.dot_dimension_numbers<[1], [0], [0], [1], [0, 0, 1, 1], [], []>} : vector<8x128xf32>, vector<128x512xf32>, vector<8x512xf32> -> vector<8x512xf32>
    %112 = arith.addf %110, %111 : vector<8x512xf32>
    %113 = vector.extract_strided_slice %112 {offsets = [0, 0], sizes = [8, 128], strides = [1, 1]} : vector<8x512xf32> to vector<8x128xf32>
    %114 = arith.negf %113 : vector<8x128xf32>
    %115 = math.exp %114 : vector<8x128xf32>
    %cst_33 = arith.constant 1.000000e+00 : f32
    %116 = vector.broadcast %cst_33 : f32 to vector<8x128xf32>
    %117 = arith.addf %116, %115 : vector<8x128xf32>
    %118 = arith.divf %116, %117 : vector<8x128xf32>
    %119 = vector.extract_strided_slice %112 {offsets = [0, 128], sizes = [8, 128], strides = [1, 1]} : vector<8x512xf32> to vector<8x128xf32>
    %120 = arith.negf %119 : vector<8x128xf32>
    %121 = math.exp %120 : vector<8x128xf32>
    %cst_34 = arith.constant 1.000000e+00 : f32
    %122 = vector.broadcast %cst_34 : f32 to vector<8x128xf32>
    %123 = arith.addf %122, %121 : vector<8x128xf32>
    %124 = arith.divf %122, %123 : vector<8x128xf32>
    %125 = vector.extract_strided_slice %112 {offsets = [0, 256], sizes = [8, 128], strides = [1, 1]} : vector<8x512xf32> to vector<8x128xf32>
    %126 = math.tanh %125 : vector<8x128xf32>
    %127 = vector.extract_strided_slice %112 {offsets = [0, 384], sizes = [8, 128], strides = [1, 1]} : vector<8x512xf32> to vector<8x128xf32>
    %128 = arith.negf %127 : vector<8x128xf32>
    %129 = math.exp %128 : vector<8x128xf32>
    %cst_35 = arith.constant 1.000000e+00 : f32
    %130 = vector.broadcast %cst_35 : f32 to vector<8x128xf32>
    %131 = arith.addf %130, %129 : vector<8x128xf32>
    %132 = arith.divf %130, %131 : vector<8x128xf32>
    %133 = arith.mulf %124, %101 : vector<8x128xf32>
    %134 = arith.mulf %118, %126 : vector<8x128xf32>
    %135 = arith.addf %133, %134 : vector<8x128xf32>
    %136 = math.tanh %135 : vector<8x128xf32>
    %137 = arith.mulf %132, %136 : vector<8x128xf32>
    %138 = arith.index_cast %c3_i32 : i32 to index
    %c0_36 = arith.constant 0 : index
    %c0_37 = arith.constant 0 : index
    %139 = vector.load %arg6[%138, %c0_36, %c0_37] : memref<4x8x128xf32, #tpu.memory_space<vmem>>, vector<1x8x128xf32>
    %140 = vector.shape_cast %139 : vector<1x8x128xf32> to vector<8x128xf32>
    %141 = vector.shape_cast %137 : vector<8x128xf32> to vector<1x8x128xf32>
    tpu.vector_store %arg6[%138, %c0_36, %c0_37], %141 {strides = array<i32>} : memref<4x8x128xf32, #tpu.memory_space<vmem>>, vector<1x8x128xf32>,
    %c4_i32 = arith.constant 4 : i32
    %c0_38 = arith.constant 0 : index
    %c0_39 = arith.constant 0 : index
    %142 = vector.load %arg8[%c0_38, %c0_39] : memref<8x128xf32, #tpu.memory_space<vmem>>, vector<8x128xf32>
    tpu.vector_store %arg8[%c0_38, %c0_39], %137 {strides = array<i32>} : memref<8x128xf32, #tpu.memory_space<vmem>>, vector<8x128xf32>,
    %c0_40 = arith.constant 0 : index
    %c0_41 = arith.constant 0 : index
    %143 = vector.load %arg9[%c0_40, %c0_41] : memref<8x128xf32, #tpu.memory_space<vmem>>, vector<8x128xf32>
    tpu.vector_store %arg9[%c0_40, %c0_41], %135 {strides = array<i32>} : memref<8x128xf32, #tpu.memory_space<vmem>>, vector<8x128xf32>,
    %c2_i32_42 = arith.constant 2 : i32
    %144 = arith.cmpi eq, %arg1, %c2_i32_42 : i32
    %145 = arith.extui %144 : i1 to i32
    %c0_i32_43 = arith.constant 0 : i32
    %146 = arith.cmpi ne, %145, %c0_i32_43 : i32
    scf.if %146 {
      %c0_44 = arith.constant 0 : index
      %c0_45 = arith.constant 0 : index
      %147 = vector.load %arg7[%c0_44, %c0_45] : memref<8x128xf32, #tpu.memory_space<vmem>>, vector<8x128xf32>
      tpu.vector_store %arg7[%c0_44, %c0_45], %135 {strides = array<i32>} : memref<8x128xf32, #tpu.memory_space<vmem>>, vector<8x128xf32>,
    } else {
    }
    return
  }
  func.func @transform_0(%arg0: i32, %arg1: i32) -> (i32, i32, i32) {
    %c0_i32 = arith.constant 0 : i32
    %c0_i32_0 = arith.constant 0 : i32
    return %arg1, %arg0, %c0_i32 : i32, i32, i32
  }
  func.func @transform_1(%arg0: i32, %arg1: i32) -> (i32, i32) {
    %c0_i32 = arith.constant 0 : i32
    %c0_i32_0 = arith.constant 0 : i32
    return %arg0, %c0_i32 : i32, i32
  }
  func.func @transform_2(%arg0: i32, %arg1: i32) -> (i32, i32) {
    %c0_i32 = arith.constant 0 : i32
    %c0_i32_0 = arith.constant 0 : i32
    return %arg0, %c0_i32 : i32, i32
  }
  func.func @transform_3(%arg0: i32, %arg1: i32) -> (i32, i32) {
    %c0_i32 = arith.constant 0 : i32
    %c0_i32_0 = arith.constant 0 : i32
    %c0_i32_1 = arith.constant 0 : i32
    return %c0_i32, %c0_i32_0 : i32, i32
  }
  func.func @transform_4(%arg0: i32, %arg1: i32) -> (i32, i32, i32) {
    %c0_i32 = arith.constant 0 : i32
    %c0_i32_0 = arith.constant 0 : i32
    return %arg1, %arg0, %c0_i32 : i32, i32, i32
  }
  func.func @transform_5(%arg0: i32, %arg1: i32) -> (i32, i32) {
    %c0_i32 = arith.constant 0 : i32
    %c0_i32_0 = arith.constant 0 : i32
    return %arg0, %c0_i32 : i32, i32
  }
}

</mosaic_0001>

<bundles_post_ra>
// kernel: tpu_custom_call.1
= control target key start
LH: loop header
LB: loop body
LE: loop exit
PB: predicated region body
PF: predicated region fallthrough
CT: control target
= control target key end

     0   :  { %11 = vsyncpa [#allocation5], 0  ;;  %s2566_s0 = inlined_call_operand.hbm [shape: f32[12,8,512], index: 0, kind: input, shape index: {}]   ;;  %s2567_s1 = inlined_call_operand.hbm [shape: f32[8,128], index: 1, kind: input, shape index: {}]   ;;  %s2568_s2 = inlined_call_operand.hbm [shape: f32[8,128], index: 2, kind: input, shape index: {}]   ;;  %s2569_s3 = inlined_call_operand.hbm [shape: f32[128,512], index: 3, kind: input, shape index: {}]   ;;  %s2570_s4 = inlined_call_operand.hbm [shape: f32[12,8,128], index: 4, kind: output, shape index: {0}]   ;;  %s2571_s5 = inlined_call_operand.hbm [shape: f32[8,128], index: 5, kind: output, shape index: {1}]  }
   0x1   :  { %13 = vsyncpa [#allocation5 + $0x1], 0 }
   0x2   :  { %14 = vsyncpa [#allocation8], 0 }
   0x3   :  { %15 = vsyncpa [#allocation11], 0 }
   0x4   :  { %16 = vsyncpa [#allocation6], 0 }
   0x5   :  { %18 = vsyncpa [#allocation6 + $0x1], 0 }
   0x6   :  { %19 = vsyncpa [#allocation14], 0  ;;  %s2027_s18 = smov 0   ;;  %s2029_s19 = smov 0  }
   0x7   :  { %s2031_s20 = smov 0   ;;  %s2033_s21 = smov 0  }
   0x8   :  { %s2035_s22 = smov 0   ;;  %s2037_s23 = smov 0  }
   0x9 LB: > { %s1269_s24 = sadd.s32 4294967295, %s1984_s23   ;;  %s1270_s25 = sadd.s32 4294967294, %s1984_s23   ;;  %s1984_s23 = sphi %s2037_s23, %s25_s23   ;;  %s1980_s22 = sphi %s2035_s22, %s2600_s22   ;;  %s1976_s21 = sphi %s2033_s21, %s2599_s21   ;;  %s1972_s20 = sphi %s2031_s20, %s2598_s20   ;;  %s1968_s19 = sphi %s2029_s19, %s2597_s19   ;;  %s1964_s18 = sphi %s2027_s18, %s2596_s18  }
   0xa   : > { %p59_p0 = scmp.ne.s32.totalorder %s1968_s19, %s1964_s18  ;;  %p2061_p1 = scmp.eq.s32.totalorder %s1269_s24, 0 }
   0xb   : > { %p2065_p2 = scmp.eq.s32.totalorder %s1269_s24, 2  ;;  %p164_p3 = scmp.eq.s32.totalorder %s1270_s25, 2 }
   0xc   : > { %s2579_s26 = scalar_select %p2061_p1, 1, 0 }
   0xd   : > { %s2580_s27 = scalar_select %p2065_p2, 1, 0 }
   0xe   : > { %p2071_p4 = por %p2061_p1, %p59_p0  ;;  %p1271_p5 = scmp.ge.s32.totalorder %s1984_s23, 1 }
   0xf   : > { %p2076_p6 = por %p164_p3, %p59_p0  ;;  %p197_p7 = scmp.lt.s32.totalorder %s1984_s23, 4 }
  0x10   : > { %s2581_s28 = scalar_select %p2071_p4, 1, 0 }
  0x11   : > { %s2582_s29 = scalar_select %p2076_p6, 1, 0 }
  0x12   : > { %p2081_p8 = pnand %p1271_p5, %p197_p7  ;;  %s1986_s6 = smov [#allocation7]  }
  0x13   : > { %s212_s7 = sshll.u32 %s1986_s6, 4  ;;  %s1987_s8 = smov [#allocation9]   ;;  %s213_s7 = int_to_ptr.vmem [resolvable:$true] %s212_s7 }
  0x14   : > { %s2583_s30 = scalar_select %p2081_p8, 1, 0 }
  0x15   : > { %p1601_p9 = pneg %p2081_p8  ;;  %s225_s9 = sshll.u32 %s1987_s8, 4  ;;  %s2093_s9 = int_to_ptr.vmem [resolvable:$true] %s225_s9 }
  0x16   : > { %s1988_s11 = smov [#allocation10]   ;;  %s1750_s15 = scalar_lea.hbm %s2567_s1, 128 }
  0x17   : > { %p2089_p10 = pnand %p1601_p9, %p2061_p1  ;;  %s235_s12 = sshll.u32 %s1988_s11, 4  ;;  %s2095_s12 = int_to_ptr.vmem [resolvable:$true] %s235_s12 }
  0x18   : > { %p1751_p11 = scmp.ne.s32.totalorder %s2567_s1, %s1750_s15  ;;  %p1757_p3 = scmp.lt.u32.totalorder %s1750_s15, %s2567_s1 }
  0x19   : > { %p2105_p12 = pneg %p2089_p10 }
  0x1b   : > { %p1753_p13 = pnand %p2105_p12, %p1751_p11 }
  0x1d   : > { %p1754_p0 = pneg %p1753_p13 }
  0x1f   : > { %p1759_p5 = pnand %p1757_p3, %p1754_p0 }
  0x21   : > { %1762 = shalt.err (!%p1759_p5)
}
  0x22   : > { %s1763_s8 = scalar_lea.vmem %s213_s7, 128  ;;  %p1771_p1 = scmp.lt.s32.totalorder %s213_s7, %s213_s7 }
  0x23   : > { %p1764_p7 = scmp.ne.s32.totalorder %s213_s7, %s1763_s8  ;;  %p1772_p4 = scmp.lt.s32.totalorder %s1763_s8, %s1763_s8 }
  0x25   : > { %p1766_p9 = pnand %p1764_p7, %p2105_p12  ;;  %p1773_p8 = por %p1772_p4, %p1771_p1 }
  0x27   : > { %p1767_p6 = pneg %p1766_p9 }
  0x29   : > { %p1774_p2 = pnand %p1773_p8, %p1767_p6 }
  0x2b   : > { %1777 = shalt.err (!%p1774_p2)
}
  0x2c   : > { %1604 = dma.hbm_to_vmem [thread:$0]  (!%p2089_p10), %s2567_s1, 128, %s213_s7, [#allocation8]  }
  0x2d   : > { %s1778_s16 = scalar_lea.hbm %s2568_s2, 128 }
  0x2e   : > { %p1779_p11 = scmp.ne.s32.totalorder %s2568_s2, %s1778_s16  ;;  %p1785_p2 = scmp.lt.u32.totalorder %s1778_s16, %s2568_s2 }
  0x30   : > { %p1781_p13 = pnand %p1779_p11, %p2105_p12 }
  0x32   : > { %p1782_p1 = pneg %p1781_p13 }
  0x34   : > { %p1787_p4 = pnand %p1785_p2, %p1782_p1 }
  0x36   : > { %1790 = shalt.err (!%p1787_p4)
}
  0x37   : > { %s1791_s7 = scalar_lea.vmem %s2093_s9, 128  ;;  %p1799_p3 = scmp.lt.s32.totalorder %s2093_s9, %s2093_s9 }
  0x38   : > { %p1792_p6 = scmp.ne.s32.totalorder %s2093_s9, %s1791_s7  ;;  %p1800_p5 = scmp.lt.s32.totalorder %s1791_s7, %s1791_s7 }
  0x3a   : > { %p1794_p8 = pnand %p1792_p6, %p2105_p12  ;;  %p1801_p7 = por %p1800_p5, %p1799_p3 }
  0x3c   : > { %p1795_p0 = pneg %p1794_p8 }
  0x3e   : > { %p1802_p9 = pnand %p1801_p7, %p1795_p0 }
  0x40   : > { %1805 = shalt.err (!%p1802_p9)
}
  0x41   : > { %1607 = dma.hbm_to_vmem [thread:$0]  (!%p2089_p10), %s2568_s2, 128, %s2093_s9, [#allocation8]  }
  0x42   : > { %s1806_s16 = scalar_lea.hbm %s2569_s3, 8192 }
  0x43   : > { %p1807_p11 = scmp.ne.s32.totalorder %s2569_s3, %s1806_s16  ;;  %p1813_p2 = scmp.lt.u32.totalorder %s1806_s16, %s2569_s3 }
  0x45   : > { %p1809_p13 = pnand %p1807_p11, %p2105_p12 }
  0x47   : > { %p1810_p1 = pneg %p1809_p13 }
  0x49   : > { %p1815_p4 = pnand %p1813_p2, %p1810_p1 }
  0x4b   : > { %1818 = shalt.err (!%p1815_p4)
}
  0x4c   : > { %s1819_s9 = scalar_lea.vmem %s2095_s12, 8192  ;;  %p1827_p3 = scmp.lt.s32.totalorder %s2095_s12, %s2095_s12 }
  0x4d   : > { %p1820_p6 = scmp.ne.s32.totalorder %s2095_s12, %s1819_s9  ;;  %p1828_p5 = scmp.lt.s32.totalorder %s1819_s9, %s1819_s9 }
  0x4f   : > { %p1822_p8 = pnand %p1820_p6, %p2105_p12  ;;  %p1829_p7 = por %p1828_p5, %p1827_p3 }
  0x51   : > { %p1823_p0 = pneg %p1822_p8 }
  0x53   : > { %p1830_p9 = pnand %p1829_p7, %p1823_p0 }
  0x55   : > { %1833 = shalt.err (!%p1830_p9)
}
  0x56   : > { %s2577_s7 = smov 512   ;;  %s2578_s24 = smov 32  }
  0x57   : > { %1610 = dma.hbm_to_vmem [thread:$0]  (!%p2089_p10), %s2569_s3, 8192, %s2095_s12, [#allocation11], %s2577_s7, %s2577_s7, %s2578_s24  }
  0x58   : > { %s46_s14 = sadd.s32 1, %s1972_s20  ;;  %s34_s15 = sadd.s32 1, %s1980_s22 }
  0x59   : > { %p53_p12 = scmp.ne.s32.totalorder %s1972_s20, %s1968_s19  ;;  %p35_p11 = scmp.ge.s32.totalorder %s34_s15, 3 }
  0x5a   : > { %p54_p13 = scmp.eq.s32.totalorder %s1984_s23, 0  ;;  %p2586_p1 = scmp.ne.s32.totalorder %s2580_s27, 0 }
  0x5b   : > { %p1622_p4 = scmp.lt.s32.totalorder %s1984_s23, 3  ;;  %s2602_s15 = smov (%p35_p11, %s34_s15), 0 }
  0x5c   : > { %p2177_p2 = por %p2586_p1, %p53_p12  ;;  %p55_p6 = por %p54_p13, %p53_p12 }
  0x5d   : > { %s249_s10 = sand.u32 1, %s1972_s20   ;;  %s41_s17 = ssub.s32 %s1980_s22, %s2602_s15 }
  0x5e   : > { %p44_p8 = scmp.eq.s32.totalorder %s41_s17, 0  ;;  %s1276_s12 = sshll.u32 %s249_s10, 7 }
  0x5f   : > { %s1323_s25 = sshll.u32 %s1980_s22, 11  ;;  %s253_s13 = scalar_lea.vmem [#allocation4], %s1276_s12 }
  0x60   : > { %s2189_s6 = scalar_select %p44_p8, %s1972_s20, %s46_s14  }
  0x61   : > { %s2194_s11 = scalar_lea.hbm %s2566_s0, %s1323_s25  ;;  %s263_s7 = sshll.u32 %s253_s13, 4  ;;  %s2196_s7 = int_to_ptr.vmem [resolvable:$true] %s263_s7 }
  0x62   : > { %p2200_p10 = pnand %p1622_p4, %p55_p6  ;;  %s2204_s14 = scalar_lea.sflag [#allocation5], %s249_s10 }
  0x63   : > { %s1834_s8 = scalar_lea.hbm %s2194_s11, 2048  ;;  %s1839_s9 = scalar_lea.hbm %s2566_s0, 6144 }
  0x64   : > { %p1835_p0 = scmp.ne.s32.totalorder %s2194_s11, %s1834_s8  ;;  %p1836_p3 = pneg %p2200_p10 }
  0x65   : > { %p1840_p9 = scmp.lt.u32.totalorder %s2194_s11, %s2566_s0  ;;  %p1841_p12 = scmp.lt.u32.totalorder %s1839_s9, %s1834_s8 }
  0x66   : > { %p1837_p5 = pnand %p1836_p3, %p1835_p0  ;;  %p1843_p13 = scmp.lt.u32.totalorder %s1834_s8, %s2194_s11 }
  0x67   : > { %p1842_p11 = por %p1841_p12, %p1840_p9 }
  0x68   : > { %p1838_p7 = pneg %p1837_p5 }
  0x69   : > { %p1844_p1 = por %p1843_p13, %p1842_p11 }
  0x6b   : > { %p1845_p4 = pnand %p1844_p1, %p1838_p7 }
  0x6d   : > { %1848 = shalt.err (!%p1845_p4)
}
  0x6e   : > { %s1849_s10 = scalar_lea.vmem %s2196_s7, 2048  ;;  %s1991_s12 = smov [#allocation4]  }
  0x6f   : > { %p1850_p6 = scmp.ne.s32.totalorder %s2196_s7, %s1849_s10  ;;  %s1854_s25 = sshll.u32 %s1991_s12, 4  ;;  %s1855_s25 = int_to_ptr.vmem [resolvable:$false] %s1854_s25 }
  0x70   : > { %s1856_s24 = scalar_lea.vmem %s1855_s25, 4096  ;;  %p1857_p5 = scmp.lt.s32.totalorder %s2196_s7, %s1855_s25 }
  0x71   : > { %p1852_p8 = pnand %p1850_p6, %p1836_p3  ;;  %p1858_p9 = scmp.lt.s32.totalorder %s1856_s24, %s1849_s10 }
  0x73   : > { %p1853_p0 = pneg %p1852_p8  ;;  %p1859_p12 = por %p1858_p9, %p1857_p5 }
  0x75   : > { %p1860_p11 = pnand %p1859_p12, %p1853_p0 }
  0x77   : > { %1863 = shalt.err (!%p1860_p11)
}
  0x78   : > { %s2589_s8 = smov 32   ;;  %s2590_s9 = smov 512  }
  0x79   : > { %1614 = dma.hbm_to_vmem [thread:$0]  (!%p2200_p10), %s2194_s11, 2048, %s2196_s7, %s2204_s14, %s2590_s9, %s2590_s9, %s2589_s8  }
  0x7a   : > { %p2591_p3 = scmp.ne.s32.totalorder %s2583_s30, 0 }
  0x7b   : > { %s2238_s13 = sand.u32 (!%p2591_p3), 1, %s1968_s19   ;;  %p2592_p7 = scmp.ne.s32.totalorder (!%p2591_p3), %s2581_s28, 0 }
  0x7c   : > { %275 = sbr.rel (%p2591_p3) target bundleno = 1265 (0x4f1), region = 36  ;;  %s1281_s10 = sshll.u32 (!%p2591_p3), %s2238_s13, 7 }
  0x7d   : > { %s278_s12 = scalar_lea.sflag (!%p2591_p3), [#allocation5], %s2238_s13  ;;  %s2242_s25 = scalar_lea.vmem (!%p2591_p3), [#allocation4], %s1281_s10 }
  0x83   : > { %1943 = dma.done.wait (%p2592_p7), %s278_s12, 2048  }
  0x84   : > { %1945 = vsyncadd (%p2592_p7), %s278_s12, 4294965248  ;;  %p2593_p10 = scmp.ne.s32.totalorder %s2579_s26, 0 }
  0x86   : > { %1947 = dma.done.wait (%p2593_p10), [#allocation8], 256  }
  0x87   : > { %1949 = vsyncadd (%p2593_p10), [#allocation8], 4294967040 }
  0x88   : > { %1951 = dma.done.wait (%p2593_p10), [#allocation11], 8192  }
  0x89   : > { %1953 = vsyncadd (%p2593_p10), [#allocation11], 4294959104  ;;  %s1285_s30 = sshll.u32 %s2238_s13, 5  ;;  %p1286_p13 = scmp.ne.s32.totalorder %s1976_s21, 0 }
  0x8a   : > { %s2257_s7 = scalar_lea.vmem [#allocation12], %s1285_s30  ;;  %v326_v0 = vld [vmem:[#allocation7] sm:$0xff] (!%p1286_p13)  ;;  %v328_v1 = vld [vmem:[#allocation9] sm:$0xff] (!%p1286_p13) }
  0x8b   : > { %325 = sbr.rel (%p1286_p13) target bundleno = 146 (0x92), region = 56  ;;  %327 = vst [vmem:[#allocation2] sm:$0xff] (!%p1286_p13), %v326_v0  ;;  %329 = vst [vmem:[#allocation3] sm:$0xff] (!%p1286_p13), %v328_v1 }
  0x92 PF: > { %v331_v2 = vld [vmem:[#allocation10 + $0x8] sm:$0xff]  ;;  %v330_v4 = vld [vmem:[#allocation10] sm:$0xff]  ;;  %v1992_v9 = vmov 0.0   ;;  %v333_v21 = vld [vmem:[#allocation10 + $0x18] sm:$0xff]  ;;  %p1314_p1 = scmp.ne.s32.totalorder %s1976_s21, 2 }
  0x93   : > { %v335_v3 = vld [vmem:[#allocation10 + $0x28] sm:$0xff]  ;;  %v334_v6 = vld [vmem:[#allocation10 + $0x20] sm:$0xff]  ;;  %464 = vmatprep.mubr.f32.mxu0 %v1992_v9  ;;  %535 = vmatprep.mubr.f32.mxu1 %v1992_v9  ;;  %v337_v22 = vld [vmem:[#allocation10 + $0x38] sm:$0xff] }
  0x94   : > { %v2260_v5 = vpack.c.bf16 %v335_v3, %v331_v2  ;;  %v339_v7 = vld [vmem:[#allocation10 + $0x48] sm:$0xff]  ;;  %v2264_v10 = vpack.c.bf16 %v334_v6, %v330_v4  ;;  %v338_v12 = vld [vmem:[#allocation10 + $0x40] sm:$0xff]  ;;  %v2275_v24 = vpack.c.bf16 %v337_v22, %v333_v21  ;;  %v332_v25 = vld [vmem:[#allocation10 + $0x10] sm:$0xff] }
  0x95   : > { %v343_v8 = vld [vmem:[#allocation10 + $0x68] sm:$0xff]  ;;  %v342_v13 = vld [vmem:[#allocation10 + $0x60] sm:$0xff]  ;;  %v336_v26 = vld [vmem:[#allocation10 + $0x30] sm:$0xff] }
  0x96   : > { %v2266_v11 = vpack.c.bf16 %v343_v8, %v339_v7  ;;  %v347_v14 = vld [vmem:[#allocation10 + $0x88] sm:$0xff]  ;;  %1326 = vmatprep.subr.bf16.mxu0 %v2260_v5  ;;  %v2270_v16 = vpack.c.bf16 %v342_v13, %v338_v12  ;;  %v346_v17 = vld [vmem:[#allocation10 + $0x80] sm:$0xff]  ;;  %v2277_v27 = vpack.c.bf16 %v336_v26, %v332_v25  ;;  %1358 = vmatprep.subr.bf16.mxu1 %v2275_v24  ;;  %v341_v29 = vld [vmem:[#allocation10 + $0x58] sm:$0xff] }
  0x97   : > { %v351_v15 = vld [vmem:[#allocation10 + $0xa8] sm:$0xff]  ;;  %1328 = vmatpush1.bf16.msra.mxu0 %v2264_v10  ;;  %v350_v18 = vld [vmem:[#allocation10 + $0xa0] sm:$0xff]  ;;  %v345_v30 = vld [vmem:[#allocation10 + $0x78] sm:$0xff] }
  0x98   : > { %1330 = vmatprep.subr.bf16.mxu0 %v2266_v11  ;;  %v2273_v19 = vpack.c.bf16 %v351_v15, %v347_v14  ;;  %v355_v20 = vld [vmem:[#allocation10 + $0xc8] sm:$0xff]  ;;  %v2280_v28 = vpack.c.bf16 %v350_v18, %v346_v17  ;;  %v340_v31 = vld [vmem:[#allocation10 + $0x50] sm:$0xff]  ;;  %v354_v33 = vld [vmem:[#allocation10 + $0xc0] sm:$0xff]  ;;  %1360 = vmatpush1.bf16.msra.mxu1 %v2277_v27  ;;  %v2287_v35 = vpack.c.bf16 %v345_v30, %v341_v29 }
  0x99   : > { %v359_v23 = vld [vmem:[#allocation10 + $0xe8] sm:$0xff]  ;;  %v358_v34 = vld [vmem:[#allocation10 + $0xe0] sm:$0xff]  ;;  %v344_v36 = vld [vmem:[#allocation10 + $0x70] sm:$0xff] }
  0x9a   : > { %v2284_v32 = vpack.c.bf16 %v359_v23, %v355_v20  ;;  %v363_v37 = vld [vmem:[#allocation10 + $0x108] sm:$0xff]  ;;  %v2289_v39 = vpack.c.bf16 %v344_v36, %v340_v31  ;;  %v349_v40 = vld [vmem:[#allocation10 + $0x98] sm:$0xff]  ;;  %1362 = vmatprep.subr.bf16.mxu1 %v2287_v35  ;;  %v348_v42 = vld [vmem:[#allocation10 + $0x90] sm:$0xff]  ;;  %v2293_v44 = vpack.c.bf16 %v358_v34, %v354_v33 }
  0x9b   : > { %1332 = vmatpush1.bf16.msra.mxu0 %v2270_v16  ;;  %v367_v38 = vld [vmem:[#allocation10 + $0x128] sm:$0xff]  ;;  %v353_v41 = vld [vmem:[#allocation10 + $0xb8] sm:$0xff]  ;;  %v352_v43 = vld [vmem:[#allocation10 + $0xb0] sm:$0xff] }
  0x9c   : > { %1334 = vmatprep.subr.bf16.mxu0 %v2273_v19  ;;  %v362_v45 = vld [vmem:[#allocation10 + $0x100] sm:$0xff]  ;;  %v2295_v47 = vpack.c.bf16 %v353_v41, %v349_v40  ;;  %v2298_v48 = vpack.c.bf16 %v367_v38, %v363_v37  ;;  %1364 = vmatpush1.bf16.msra.mxu1 %v2289_v39  ;;  %v371_v49 = vld [vmem:[#allocation10 + $0x148] sm:$0xff]  ;;  %v2301_v50 = vpack.c.bf16 %v352_v43, %v348_v42  ;;  %v357_v51 = vld [vmem:[#allocation10 + $0xd8] sm:$0xff] }
  0x9d   : > { %v366_v46 = vld [vmem:[#allocation10 + $0x120] sm:$0xff]  ;;  %v361_v52 = vld [vmem:[#allocation10 + $0xf8] sm:$0xff]  ;;  %v375_v53 = vld [vmem:[#allocation10 + $0x168] sm:$0xff] }
  0x9e   : > { %1366 = vmatprep.subr.bf16.mxu1 %v2295_v47  ;;  %v2304_v54 = vpack.c.bf16 %v361_v52, %v357_v51  ;;  %v356_v55 = vld [vmem:[#allocation10 + $0xd0] sm:$0xff]  ;;  %v2307_v57 = vpack.c.bf16 %v366_v46, %v362_v45  ;;  %v365_v58 = vld [vmem:[#allocation10 + $0x118] sm:$0xff]  ;;  %v2310_v60 = vpack.c.bf16 %v375_v53, %v371_v49  ;;  %v370_v61 = vld [vmem:[#allocation10 + $0x140] sm:$0xff] }
  0x9f   : > { %1336 = vmatpush1.bf16.msra.mxu0 %v2280_v28  ;;  %v360_v56 = vld [vmem:[#allocation10 + $0xf0] sm:$0xff]  ;;  %v369_v59 = vld [vmem:[#allocation10 + $0x138] sm:$0xff]  ;;  %v374_v62 = vld [vmem:[#allocation10 + $0x160] sm:$0xff] }
  0xa0   : > { %1338 = vmatprep.subr.bf16.mxu0 %v2284_v32  ;;  %1368 = vmatpush1.bf16.msra.mxu1 %v2301_v50  ;;  %v379_v63 = vld [vmem:[#allocation10 + $0x188] sm:$0xff]  ;;  %v2313_v0 = vpack.c.bf16 %v360_v56, %v356_v55  ;;  %v2316_v2 = vpack.c.bf16 %v369_v59, %v365_v58  ;;  %v364_v3 = vld [vmem:[#allocation10 + $0x110] sm:$0xff]  ;;  %v373_v6 = vld [vmem:[#allocation10 + $0x158] sm:$0xff]  ;;  %v2319_v8 = vpack.c.bf16 %v374_v62, %v370_v61 }
  0xa1   : > { %v383_v1 = vld [vmem:[#allocation10 + $0x1a8] sm:$0xff]  ;;  %1370 = vmatprep.subr.bf16.mxu1 %v2304_v54  ;;  %v368_v4 = vld [vmem:[#allocation10 + $0x130] sm:$0xff]  ;;  %v377_v7 = vld [vmem:[#allocation10 + $0x178] sm:$0xff] }
  0xa2   : > { %v2322_v12 = vpack.c.bf16 %v383_v1, %v379_v63  ;;  %v378_v13 = vld [vmem:[#allocation10 + $0x180] sm:$0xff]  ;;  %v387_v15 = vld [vmem:[#allocation10 + $0x1c8] sm:$0xff]  ;;  %v2325_v17 = vpack.c.bf16 %v368_v4, %v364_v3  ;;  %v2328_v20 = vpack.c.bf16 %v377_v7, %v373_v6  ;;  %v372_v21 = vld [vmem:[#allocation10 + $0x150] sm:$0xff] }
  0xa3   : > { %1340 = vmatpush1.bf16.msra.mxu0 %v2293_v44  ;;  %v382_v14 = vld [vmem:[#allocation10 + $0x1a0] sm:$0xff]  ;;  %v391_v18 = vld [vmem:[#allocation10 + $0x1e8] sm:$0xff]  ;;  %v376_v22 = vld [vmem:[#allocation10 + $0x170] sm:$0xff] }
  0xa4   : > { %1342 = vmatprep.subr.bf16.mxu0 %v2298_v48  ;;  %1372 = vmatpush1.bf16.msra.mxu1 %v2313_v0  ;;  %v381_v23 = vld [vmem:[#allocation10 + $0x198] sm:$0xff]  ;;  %v2331_v26 = vpack.c.bf16 %v382_v14, %v378_v13  ;;  %v2334_v29 = vpack.c.bf16 %v391_v18, %v387_v15  ;;  %v386_v30 = vld [vmem:[#allocation10 + $0x1c0] sm:$0xff]  ;;  %v2337_v33 = vpack.c.bf16 %v376_v22, %v372_v21  ;;  %v380_v36 = vld [vmem:[#allocation10 + $0x190] sm:$0xff] }
  0xa5   : > { %1374 = vmatprep.subr.bf16.mxu1 %v2316_v2  ;;  %v385_v25 = vld [vmem:[#allocation10 + $0x1b8] sm:$0xff]  ;;  %v390_v31 = vld [vmem:[#allocation10 + $0x1e0] sm:$0xff]  ;;  %v384_v37 = vld [vmem:[#allocation10 + $0x1b0] sm:$0xff] }
  0xa6   : > { %v2340_v34 = vpack.c.bf16 %v385_v25, %v381_v23  ;;  %v389_v38 = vld [vmem:[#allocation10 + $0x1d8] sm:$0xff]  ;;  %v2343_v41 = vpack.c.bf16 %v390_v31, %v386_v30  ;;  %v2347_v42 = vpack.c.bf16 %v384_v37, %v380_v36  ;;  %v388_v45 = vld [vmem:[#allocation10 + $0x1d0] sm:$0xff]  ;;  %v394_v49 = vld [vmem:[#allocation2] sm:$0xff] }
  0xa7   : > { %1344 = vmatpush1.bf16.msra.mxu0 %v2307_v57  ;;  %v393_v40 = vld [vmem:[#allocation10 + $0x1f8] sm:$0xff]  ;;  %v392_v46 = vld [vmem:[#allocation10 + $0x1f0] sm:$0xff]  ;;  %v399_v63 = vld [vmem:[%s2242_s25 + $0x18] sm:$0xff] }
  0xa8   : > { %1346 = vmatprep.subr.bf16.mxu0 %v2310_v60  ;;  %1376 = vmatpush1.bf16.msra.mxu1 %v2325_v17  ;;  %v2350_v43 = vpack.c.bf16 %v393_v40, %v389_v38  ;;  %v2354_v51 = vpack.c.bf16 %v392_v46, %v388_v45  ;;  %v396_v52 = vld [vmem:[%s2242_s25] sm:$0xff]  ;;  %v397_v53 = vld [vmem:[%s2242_s25 + $0x8] sm:$0xff]  ;;  %v398_v6 = vld [vmem:[%s2242_s25 + $0x10] sm:$0xff] }
  0xa9   : > { %1378 = vmatprep.subr.bf16.mxu1 %v2328_v20  ;;  %v395_v25 = vld [vmem:[#allocation3] sm:$0xff] }
  0xab   : > { %1348 = vmatpush1.bf16.msra.mxu0 %v2319_v8 }
  0xac   : > { %1350 = vmatprep.subr.bf16.mxu0 %v2322_v12  ;;  %1380 = vmatpush1.bf16.msra.mxu1 %v2337_v33 }
  0xad   : > { %1382 = vmatprep.subr.bf16.mxu1 %v2340_v34 }
  0xaf   : > { %1352 = vmatpush1.bf16.msra.mxu0 %v2331_v26 }
  0xb0   : > { %1354 = vmatprep.subr.bf16.mxu0 %v2334_v29  ;;  %1384 = vmatpush1.bf16.msra.mxu1 %v2347_v42 }
  0xb1   : > { %1386 = vmatprep.subr.bf16.mxu1 %v2350_v43 }
  0xb3   : > { %1356 = vmatpush1.bf16.msra.mxu0 %v2343_v41 }
  0xb4   : > { %1390 = vmatprep.subr.bf16.mxu0 %v2260_v5  ;;  %1388 = vmatpush1.bf16.msra.mxu1 %v2354_v51 }
  0xb5   : > { %1422 = vmatprep.subr.bf16.mxu1 %v2275_v24 }
  0xb6   : > { %465 = vmatmul.mubr.f32.vlgmr.msra.gmra.mrb[0].mxu0 %v394_v49 }
  0xb7   : > { %1392 = vmatpush1.bf16.msra.mxu0 %v2264_v10  ;;  %640 = vmatprep.mubr.f32.mxu0 %v1992_v9 }
  0xb8   : > { %1394 = vmatprep.subr.bf16.mxu0 %v2266_v11  ;;  %536 = vmatmul.mubr.f32.vlgmr.msra.gmra.mrb[0].mxu1 %v394_v49 }
  0xb9   : > { %1424 = vmatpush1.bf16.msra.mxu1 %v2277_v27  ;;  %711 = vmatprep.mubr.f32.mxu1 %v1992_v9 }
  0xba   : > { %1426 = vmatprep.subr.bf16.mxu1 %v2287_v35 }
  0xbb   : > { %1396 = vmatpush1.bf16.msra.mxu0 %v2270_v16 }
  0xbc   : > { %1398 = vmatprep.subr.bf16.mxu0 %v2273_v19 }
  0xbd   : > { %1428 = vmatpush1.bf16.msra.mxu1 %v2289_v39 }
  0xbe   : > { %1430 = vmatprep.subr.bf16.mxu1 %v2295_v47 }
  0xbf   : > { %1400 = vmatpush1.bf16.msra.mxu0 %v2280_v28 }
  0xc0   : > { %1402 = vmatprep.subr.bf16.mxu0 %v2284_v32 }
  0xc1   : > { %1432 = vmatpush1.bf16.msra.mxu1 %v2301_v50 }
  0xc2   : > { %1434 = vmatprep.subr.bf16.mxu1 %v2304_v54 }
  0xc3   : > { %1404 = vmatpush1.bf16.msra.mxu0 %v2293_v44 }
  0xc4   : > { %1406 = vmatprep.subr.bf16.mxu0 %v2298_v48 }
  0xc5   : > { %1436 = vmatpush1.bf16.msra.mxu1 %v2313_v0 }
  0xc6   : > { %1438 = vmatprep.subr.bf16.mxu1 %v2316_v2 }
  0xc7   : > { %1408 = vmatpush1.bf16.msra.mxu0 %v2307_v57 }
  0xc8   : > { %1410 = vmatprep.subr.bf16.mxu0 %v2310_v60 }
  0xc9   : > { %1440 = vmatpush1.bf16.msra.mxu1 %v2325_v17 }
  0xca   : > { %1442 = vmatprep.subr.bf16.mxu1 %v2328_v20 }
  0xcb   : > { %1412 = vmatpush1.bf16.msra.mxu0 %v2319_v8 }
  0xcc   : > { %1414 = vmatprep.subr.bf16.mxu0 %v2322_v12 }
  0xcd   : > { %1444 = vmatpush1.bf16.msra.mxu1 %v2337_v33 }
  0xce   : > { %1446 = vmatprep.subr.bf16.mxu1 %v2340_v34 }
  0xcf   : > { %1416 = vmatpush1.bf16.msra.mxu0 %v2331_v26 }
  0xd0   : > { %1418 = vmatprep.subr.bf16.mxu0 %v2334_v29 }
  0xd1   : > { %1448 = vmatpush1.bf16.msra.mxu1 %v2347_v42 }
  0xd2   : > { %1450 = vmatprep.subr.bf16.mxu1 %v2350_v43 }
  0xd3   : > { %1420 = vmatpush1.bf16.msra.mxu0 %v2343_v41 }
  0xd4   : > { %1454 = vmatprep.subr.bf16.mxu0 %v2260_v5 }
  0xd5   : > { %1452 = vmatpush1.bf16.msra.mxu1 %v2354_v51 }
  0xd6   : > { %1486 = vmatprep.subr.bf16.mxu1 %v2275_v24 }
 0x189   : > { %v466_v55 = vpop.f32.mrb[0].mxu0 }
 0x18a   : > { %v542_v56 = vadd.f32 %v466_v55, %v396_v52  ;;  %v468_v58 = vpop.f32.mrb[1].mxu0  ;;  %v1290_v52 = vld [vmem:[%s2242_s25 + $0x20] sm:$0xff] }
 0x18b   : > { %v543_v59 = vadd.f32 %v468_v58, %v397_v53  ;;  %v537_v1 = vpop.f32.mrb[0].mxu1  ;;  %v1291_v53 = vld [vmem:[%s2242_s25 + $0x28] sm:$0xff] }
 0x18c   : > { %v1287_v61 = vmul.f32 -1.442695, %v542_v56  ;;  %v539_v3 = vpop.f32.mrb[1].mxu1  ;;  %v544_v13 = vadd.f32 %v537_v1, %v398_v6  ;;  %v1292_v6 = vld [vmem:[%s2242_s25 + $0x30] sm:$0xff] }
 0x18d   : > { %v1288_v62 = vmul.f32 -1.442695, %v543_v59  ;;  %v545_v4 = vadd.f32 %v539_v3, %v399_v63  ;;  %v1293_v3 = vld [vmem:[%s2242_s25 + $0x38] sm:$0xff] }
 0x18e   : > { %1686 = vpow2.f32 %v1287_v61 }
 0x18f   : > { %1688 = vpow2.f32 %v1288_v62  ;;  %v1289_v7 = vmul.f32 -1.442695, %v545_v4 }
 0x191   : > { %1690 = vpow2.f32 %v1289_v7 }
 0x192   : > { %1692 = vtanh.f32 %v544_v13 }
 0x198   : > { %v1687_v14 = vpop.eup %1686 }
 0x199   : > { %v1689_v15 = vpop.eup %1688  ;;  %v549_v18 = vadd.f32 1.0, %v1687_v14 }
 0x19a   : > { %v555_v21 = vadd.f32 1.0, %v1689_v15 }
 0x19b   : > { %1694 = vrcp.f32 %v549_v18  ;;  %v1691_v22 = vpop.eup %1690 }
 0x19c   : > { %1696 = vrcp.f32 %v555_v21  ;;  %v1693_v23 = vpop.eup %1692  ;;  %v562_v31 = vadd.f32 1.0, %v1691_v22 }
 0x19e   : > { %1698 = vrcp.f32 %v562_v31 }
 0x1a5   : > { %v1695_v30 = vpop.eup %1694 }
 0x1a6   : > { %v1697_v36 = vpop.eup %1696  ;;  %v566_v37 = vmul.f32 %v1695_v30, %v1693_v23 }
 0x1a7   : > { %v565_v38 = vmul.f32 %v1697_v36, %v395_v25 }
 0x1a8   : > { %v1699_v45 = vpop.eup %1698 }
 0x1a9   : > { %v2398_v40 = vadd.f32 %v566_v37, %v565_v38 }
 0x1ab   : > { %1700 = vtanh.f32 %v2398_v40 }
 0x1b5   : > { %v1701_v46 = vpop.eup %1700 }
 0x1b6   : > { %v569_v49 = vmul.f32 %v1701_v46, %v1699_v45 }
 0x1b8   : > { %570 = vst [vmem:[%s2257_s7] sm:$0xff] %v569_v49  ;;  %641 = vmatmul.mubr.f32.vlgmr.msra.gmra.mrb[2].mxu0 %v569_v49  ;;  %712 = vmatmul.mubr.f32.vlgmr.msra.gmra.mrb[2].mxu1 %v569_v49 }
 0x1b9   : > { %1456 = vmatpush1.bf16.msra.mxu0 %v2264_v10  ;;  %1488 = vmatpush1.bf16.msra.mxu1 %v2277_v27 }
 0x1ba   : > { %1458 = vmatprep.subr.bf16.mxu0 %v2266_v11  ;;  %1490 = vmatprep.subr.bf16.mxu1 %v2287_v35 }
 0x1bb   : > { %817 = vmatprep.mubr.f32.mxu0 %v1992_v9  ;;  %888 = vmatprep.mubr.f32.mxu1 %v1992_v9 }
 0x1bd   : > { %1460 = vmatpush1.bf16.msra.mxu0 %v2270_v16  ;;  %1492 = vmatpush1.bf16.msra.mxu1 %v2289_v39 }
 0x1be   : > { %1462 = vmatprep.subr.bf16.mxu0 %v2273_v19  ;;  %1494 = vmatprep.subr.bf16.mxu1 %v2295_v47 }
 0x1c1   : > { %1464 = vmatpush1.bf16.msra.mxu0 %v2280_v28  ;;  %1496 = vmatpush1.bf16.msra.mxu1 %v2301_v50 }
 0x1c2   : > { %1466 = vmatprep.subr.bf16.mxu0 %v2284_v32  ;;  %1498 = vmatprep.subr.bf16.mxu1 %v2304_v54 }
 0x1c5   : > { %1468 = vmatpush1.bf16.msra.mxu0 %v2293_v44  ;;  %1500 = vmatpush1.bf16.msra.mxu1 %v2313_v0 }
 0x1c6   : > { %1470 = vmatprep.subr.bf16.mxu0 %v2298_v48  ;;  %1502 = vmatprep.subr.bf16.mxu1 %v2316_v2 }
 0x1c9   : > { %1472 = vmatpush1.bf16.msra.mxu0 %v2307_v57  ;;  %1504 = vmatpush1.bf16.msra.mxu1 %v2325_v17 }
 0x1ca   : > { %1474 = vmatprep.subr.bf16.mxu0 %v2310_v60  ;;  %1506 = vmatprep.subr.bf16.mxu1 %v2328_v20 }
 0x1cd   : > { %1476 = vmatpush1.bf16.msra.mxu0 %v2319_v8  ;;  %1508 = vmatpush1.bf16.msra.mxu1 %v2337_v33 }
 0x1ce   : > { %1478 = vmatprep.subr.bf16.mxu0 %v2322_v12  ;;  %1510 = vmatprep.subr.bf16.mxu1 %v2340_v34 }
 0x1d1   : > { %1480 = vmatpush1.bf16.msra.mxu0 %v2331_v26  ;;  %1512 = vmatpush1.bf16.msra.mxu1 %v2347_v42 }
 0x1d2   : > { %1482 = vmatprep.subr.bf16.mxu0 %v2334_v29  ;;  %1514 = vmatprep.subr.bf16.mxu1 %v2350_v43 }
 0x1d5   : > { %1484 = vmatpush1.bf16.msra.mxu0 %v2343_v41  ;;  %1516 = vmatpush1.bf16.msra.mxu1 %v2354_v51 }
 0x1d6   : > { %1518 = vmatprep.subr.bf16.mxu0 %v2260_v5  ;;  %1550 = vmatprep.subr.bf16.mxu1 %v2275_v24 }
 0x28b   : > { %v642_v55 = vpop.f32.mrb[2].mxu0  ;;  %v713_v56 = vpop.f32.mrb[2].mxu1 }
 0x28c   : > { %v718_v58 = vadd.f32 %v1290_v52, %v642_v55  ;;  %v644_v59 = vpop.f32.mrb[3].mxu0  ;;  %v715_v61 = vpop.f32.mrb[3].mxu1  ;;  %v720_v5 = vadd.f32 %v1292_v6, %v713_v56 }
 0x28d   : > { %v719_v62 = vadd.f32 %v1291_v53, %v644_v59  ;;  %v721_v4 = vadd.f32 %v1293_v3, %v715_v61  ;;  %v1309_v61 = vld [vmem:[%s2242_s25 + $0x78] sm:$0xff] }
 0x28e   : > { %v1294_v63 = vmul.f32 -1.442695, %v718_v58 }
 0x28f   : > { %v1295_v1 = vmul.f32 -1.442695, %v719_v62  ;;  %v1296_v7 = vmul.f32 -1.442695, %v721_v4 }
 0x290   : > { %1702 = vpow2.f32 %v1294_v63  ;;  %v1308_v63 = vld [vmem:[%s2242_s25 + $0x70] sm:$0xff] }
 0x291   : > { %1704 = vpow2.f32 %v1295_v1 }
 0x292   : > { %1706 = vpow2.f32 %v1296_v7 }
 0x293   : > { %1708 = vtanh.f32 %v720_v5 }
 0x29a   : > { %v1703_v13 = vpop.eup %1702 }
 0x29b   : > { %v1705_v14 = vpop.eup %1704  ;;  %v725_v24 = vadd.f32 1.0, %v1703_v13 }
 0x29c   : > { %v731_v15 = vadd.f32 1.0, %v1705_v14  ;;  %v1707_v18 = vpop.eup %1706 }
 0x29d   : > { %1710 = vrcp.f32 %v725_v24  ;;  %v1709_v21 = vpop.eup %1708  ;;  %v738_v30 = vadd.f32 1.0, %v1707_v18 }
 0x29e   : > { %1712 = vrcp.f32 %v731_v15 }
 0x29f   : > { %1714 = vrcp.f32 %v738_v30 }
 0x2a7   : > { %v1711_v22 = vpop.eup %1710 }
 0x2a8   : > { %v1713_v23 = vpop.eup %1712  ;;  %v742_v25 = vmul.f32 %v1711_v22, %v1709_v21 }
 0x2a9   : > { %v741_v31 = vmul.f32 %v1713_v23, %v2398_v40  ;;  %v1715_v37 = vpop.eup %1714  ;;  %v1307_v40 = vld [vmem:[%s2242_s25 + $0x68] sm:$0xff] }
 0x2ab   : > { %v2441_v36 = vadd.f32 %v742_v25, %v741_v31 }
 0x2ad   : > { %1716 = vtanh.f32 %v2441_v36 }
 0x2b7   : > { %v1717_v38 = vpop.eup %1716 }
 0x2b8   : > { %v745_v45 = vmul.f32 %v1717_v38, %v1715_v37 }
 0x2ba   : > { %1297 = vst [vmem:[%s2257_s7 + $0x8] sm:$0xff] %v745_v45  ;;  %818 = vmatmul.mubr.f32.vlgmr.msra.gmra.mrb[4].mxu0 %v745_v45  ;;  %889 = vmatmul.mubr.f32.vlgmr.msra.gmra.mrb[4].mxu1 %v745_v45 }
 0x2bb   : > { %1520 = vmatpush1.bf16.msra.mxu0 %v2264_v10  ;;  %1552 = vmatpush1.bf16.msra.mxu1 %v2277_v27  ;;  %v1299_v10 = vld [vmem:[%s2242_s25 + $0x48] sm:$0xff] }
 0x2bc   : > { %1522 = vmatprep.subr.bf16.mxu0 %v2266_v11  ;;  %1554 = vmatprep.subr.bf16.mxu1 %v2287_v35 }
 0x2bd   : > { %994 = vmatprep.mubr.f32.mxu0 %v1992_v9  ;;  %1065 = vmatprep.mubr.f32.mxu1 %v1992_v9  ;;  %v1298_v9 = vld [vmem:[%s2242_s25 + $0x40] sm:$0xff] }
 0x2bf   : > { %1524 = vmatpush1.bf16.msra.mxu0 %v2270_v16  ;;  %1556 = vmatpush1.bf16.msra.mxu1 %v2289_v39 }
 0x2c0   : > { %1526 = vmatprep.subr.bf16.mxu0 %v2273_v19  ;;  %1558 = vmatprep.subr.bf16.mxu1 %v2295_v47 }
 0x2c3   : > { %1528 = vmatpush1.bf16.msra.mxu0 %v2280_v28  ;;  %1560 = vmatpush1.bf16.msra.mxu1 %v2301_v50 }
 0x2c4   : > { %1530 = vmatprep.subr.bf16.mxu0 %v2284_v32  ;;  %1562 = vmatprep.subr.bf16.mxu1 %v2304_v54 }
 0x2c7   : > { %1532 = vmatpush1.bf16.msra.mxu0 %v2293_v44  ;;  %1564 = vmatpush1.bf16.msra.mxu1 %v2313_v0  ;;  %v1301_v44 = vld [vmem:[%s2242_s25 + $0x58] sm:$0xff] }
 0x2c8   : > { %1534 = vmatprep.subr.bf16.mxu0 %v2298_v48  ;;  %1566 = vmatprep.subr.bf16.mxu1 %v2316_v2  ;;  %v1300_v48 = vld [vmem:[%s2242_s25 + $0x50] sm:$0xff] }
 0x2cb   : > { %1536 = vmatpush1.bf16.msra.mxu0 %v2307_v57  ;;  %1568 = vmatpush1.bf16.msra.mxu1 %v2325_v17 }
 0x2cc   : > { %1538 = vmatprep.subr.bf16.mxu0 %v2310_v60  ;;  %1570 = vmatprep.subr.bf16.mxu1 %v2328_v20 }
 0x2cf   : > { %1540 = vmatpush1.bf16.msra.mxu0 %v2319_v8  ;;  %1572 = vmatpush1.bf16.msra.mxu1 %v2337_v33 }
 0x2d0   : > { %1542 = vmatprep.subr.bf16.mxu0 %v2322_v12  ;;  %1574 = vmatprep.subr.bf16.mxu1 %v2340_v34 }
 0x2d3   : > { %1544 = vmatpush1.bf16.msra.mxu0 %v2331_v26  ;;  %1576 = vmatpush1.bf16.msra.mxu1 %v2347_v42 }
 0x2d4   : > { %1546 = vmatprep.subr.bf16.mxu0 %v2334_v29  ;;  %1578 = vmatprep.subr.bf16.mxu1 %v2350_v43 }
 0x2d7   : > { %1548 = vmatpush1.bf16.msra.mxu0 %v2343_v41  ;;  %1580 = vmatpush1.bf16.msra.mxu1 %v2354_v51  ;;  %v1306_v51 = vld [vmem:[%s2242_s25 + $0x60] sm:$0xff] }
 0x38d   : > { %v819_v11 = vpop.f32.mrb[4].mxu0  ;;  %v890_v16 = vpop.f32.mrb[4].mxu1 }
 0x38e   : > { %v895_v19 = vadd.f32 %v1298_v9, %v819_v11  ;;  %v821_v27 = vpop.f32.mrb[5].mxu0  ;;  %v892_v28 = vpop.f32.mrb[5].mxu1  ;;  %v897_v54 = vadd.f32 %v1300_v48, %v890_v16 }
 0x38f   : > { %v896_v32 = vadd.f32 %v1299_v10, %v821_v27  ;;  %v898_v47 = vadd.f32 %v1301_v44, %v892_v28 }
 0x390   : > { %v1302_v35 = vmul.f32 -1.442695, %v895_v19 }
 0x391   : > { %v1303_v39 = vmul.f32 -1.442695, %v896_v32  ;;  %v1304_v50 = vmul.f32 -1.442695, %v898_v47 }
 0x392   : > { %1718 = vpow2.f32 %v1302_v35 }
 0x393   : > { %1720 = vpow2.f32 %v1303_v39 }
 0x394   : > { %1722 = vpow2.f32 %v1304_v50 }
 0x395   : > { %1724 = vtanh.f32 %v897_v54 }
 0x39c   : > { %v1719_v57 = vpop.eup %1718 }
 0x39d   : > { %v1721_v60 = vpop.eup %1720  ;;  %v902_v0 = vadd.f32 1.0, %v1719_v57 }
 0x39e   : > { %v908_v2 = vadd.f32 1.0, %v1721_v60  ;;  %v1723_v8 = vpop.eup %1722 }
 0x39f   : > { %1726 = vrcp.f32 %v902_v0  ;;  %v1725_v12 = vpop.eup %1724  ;;  %v915_v29 = vadd.f32 1.0, %v1723_v8 }
 0x3a0   : > { %1728 = vrcp.f32 %v908_v2 }
 0x3a1   : > { %1730 = vrcp.f32 %v915_v29 }
 0x3a9   : > { %v1727_v17 = vpop.eup %1726 }
 0x3aa   : > { %v1729_v20 = vpop.eup %1728  ;;  %v919_v26 = vmul.f32 %v1727_v17, %v1725_v12 }
 0x3ab   : > { %v918_v33 = vmul.f32 %v1729_v20, %v2441_v36  ;;  %v1731_v41 = vpop.eup %1730 }
 0x3ad   : > { %v920_v34 = vadd.f32 %v919_v26, %v918_v33 }
 0x3af   : > { %1732 = vtanh.f32 %v920_v34 }
 0x3b9   : > { %v1733_v42 = vpop.eup %1732 }
 0x3ba   : > { %v922_v43 = vmul.f32 %v1733_v42, %v1731_v41 }
 0x3bc   : > { %1305 = vst [vmem:[%s2257_s7 + $0x10] sm:$0xff] %v922_v43  ;;  %995 = vmatmul.mubr.f32.vlgmr.msra.gmra.mrb[6].mxu0 %v922_v43  ;;  %1066 = vmatmul.mubr.f32.vlgmr.msra.gmra.mrb[6].mxu1 %v922_v43 }
 0x48f   : > { %v996_v46 = vpop.f32.mrb[6].mxu0  ;;  %v1067_v49 = vpop.f32.mrb[6].mxu1 }
 0x490   : > { %v1072_v52 = vadd.f32 %v1306_v51, %v996_v46  ;;  %v998_v53 = vpop.f32.mrb[7].mxu0  ;;  %v1069_v55 = vpop.f32.mrb[7].mxu1  ;;  %v1074_v3 = vadd.f32 %v1308_v63, %v1067_v49 }
 0x491   : > { %v1073_v56 = vadd.f32 %v1307_v40, %v998_v53  ;;  %v1075_v62 = vadd.f32 %v1309_v61, %v1069_v55 }
 0x492   : > { %v1310_v58 = vmul.f32 -1.442695, %v1072_v52 }
 0x493   : > { %v1311_v59 = vmul.f32 -1.442695, %v1073_v56  ;;  %v1312_v1 = vmul.f32 -1.442695, %v1075_v62 }
 0x494   : > { %1734 = vpow2.f32 %v1310_v58 }
 0x495   : > { %1736 = vpow2.f32 %v1311_v59 }
 0x496   : > { %1738 = vpow2.f32 %v1312_v1 }
 0x497   : > { %1740 = vtanh.f32 %v1074_v3 }
 0x49e   : > { %v1735_v4 = vpop.eup %1734 }
 0x49f   : > { %v1737_v6 = vpop.eup %1736  ;;  %v1079_v7 = vadd.f32 1.0, %v1735_v4 }
 0x4a0   : > { %v1085_v5 = vadd.f32 1.0, %v1737_v6  ;;  %v1739_v13 = vpop.eup %1738 }
 0x4a1   : > { %1742 = vrcp.f32 %v1079_v7  ;;  %v1741_v14 = vpop.eup %1740  ;;  %v1092_v21 = vadd.f32 1.0, %v1739_v13 }
 0x4a2   : > { %1744 = vrcp.f32 %v1085_v5 }
 0x4a3   : > { %1746 = vrcp.f32 %v1092_v21 }
 0x4ab   : > { %v1743_v24 = vpop.eup %1742 }
 0x4ac   : > { %v1745_v15 = vpop.eup %1744  ;;  %v1096_v18 = vmul.f32 %v1743_v24, %v1741_v14 }
 0x4ad   : > { %v1095_v22 = vmul.f32 %v1745_v15, %v920_v34  ;;  %v1747_v25 = vpop.eup %1746 }
 0x4af   : > { %v1097_v23 = vadd.f32 %v1096_v18, %v1095_v22 }
 0x4b1   : > { %1748 = vtanh.f32 %v1097_v23  ;;  %1103 = vst [vmem:[#allocation3] sm:$0xff] %v1097_v23  ;;  %1108 = vst [vmem:[#allocation13] sm:$0xff] (!%p1314_p1), %v1097_v23 }
 0x4b8   : > { %1107 = sbr.rel (%p1314_p1) target bundleno = 1215 (0x4bf), region = 60 }
 0x4bb   : > { %v1749_v30 = vpop.eup %1748 }
 0x4bc   : > { %v1099_v31 = vmul.f32 %v1749_v30, %v1747_v25 }
 0x4be   : > { %1313 = vst [vmem:[%s2257_s7 + $0x18] sm:$0xff] %v1099_v31  ;;  %1102 = vst [vmem:[#allocation2] sm:$0xff] %v1099_v31 }
 0x4bf PF: > { %s1324_s26 = sshll.u32 %s1976_s21, 9  ;;  %s1124_s14 = sshll.u32 %s2257_s7, 4  ;;  %s2496_s14 = int_to_ptr.vmem [resolvable:$true] %s1124_s14 }
 0x4c0   : > { %s2493_s17 = scalar_lea.hbm %s2570_s4, %s1324_s26  ;;  %s1110_s24 = scalar_lea.sflag [#allocation6], %s2238_s13 }
 0x4c1   : > { %s1864_s8 = scalar_lea.vmem %s2496_s14, 512  ;;  %s1993_s9 = smov [#allocation12]  }
 0x4c2   : > { %p1865_p4 = scmp.ne.s32.totalorder %s2496_s14, %s1864_s8  ;;  %s1868_s10 = sshll.u32 %s1993_s9, 4  ;;  %s1869_s10 = int_to_ptr.vmem [resolvable:$false] %s1868_s10 }
 0x4c3   : > { %s1870_s21 = scalar_lea.vmem %s1869_s10, 1024  ;;  %p1871_p0 = scmp.lt.s32.totalorder %s2496_s14, %s1869_s10 }
 0x4c4   : > { %p1866_p6 = pnand %p1865_p4, %p2177_p2  ;;  %p1872_p5 = scmp.lt.s32.totalorder %s1870_s21, %s1864_s8 }
 0x4c6   : > { %p1867_p8 = pneg %p1866_p6  ;;  %p1873_p9 = por %p1872_p5, %p1871_p0 }
 0x4c8   : > { %p1874_p12 = pnand %p1873_p9, %p1867_p8 }
 0x4ca   : > { %1877 = shalt.err (!%p1874_p12)
}
 0x4cb   : > { %s1878_s12 = scalar_lea.hbm %s2493_s17, 512  ;;  %s1882_s7 = scalar_lea.hbm %s2570_s4, 1536 }
 0x4cc   : > { %p1879_p11 = scmp.ne.s32.totalorder %s2493_s17, %s1878_s12  ;;  %p1883_p10 = scmp.lt.u32.totalorder %s2493_s17, %s2570_s4 }
 0x4cd   : > { %p1884_p13 = scmp.lt.u32.totalorder %s1882_s7, %s1878_s12  ;;  %p1886_p4 = scmp.lt.u32.totalorder %s1878_s12, %s2493_s17 }
 0x4ce   : > { %p1880_p3 = pnand %p1879_p11, %p2177_p2 }
 0x4cf   : > { %p1885_p1 = por %p1884_p13, %p1883_p10 }
 0x4d0   : > { %p1881_p7 = pneg %p1880_p3 }
 0x4d1   : > { %p1887_p6 = por %p1886_p4, %p1885_p1 }
 0x4d3   : > { %p1888_p8 = pnand %p1887_p6, %p1881_p7 }
 0x4d5   : > { %1891 = shalt.err (!%p1888_p8)
}
 0x4d6   : > { %s1994_s11 = smov 128   ;;  %s1995_s8 = smov 8  }
 0x4d7   : > { %1595 = dma.vmem_to_hbm [thread:$0]  (%p2177_p2), %s2496_s14, 512, %s2493_s17, %s1110_s24, %s1994_s11, %s1994_s11, %s1995_s8  }
 0x4d8   : > { %s1996_s9 = smov [#allocation13]   ;;  %p2594_p5 = scmp.ne.s32.totalorder %s2580_s27, 0 }
 0x4d9   : > { %s1140_s10 = sshll.u32 %s1996_s9, 4  ;;  %s1141_s10 = int_to_ptr.vmem [resolvable:$true] %s1140_s10 }
 0x4da   : > { %s1892_s21 = scalar_lea.vmem %s1141_s10, 128  ;;  %p1899_p11 = scmp.lt.s32.totalorder %s1141_s10, %s1141_s10 }
 0x4db   : > { %p1893_p0 = scmp.ne.s32.totalorder %s1141_s10, %s1892_s21  ;;  %p1900_p3 = scmp.lt.s32.totalorder %s1892_s21, %s1892_s21 }
 0x4dd   : > { %p1894_p9 = pnand %p1893_p0, %p2594_p5  ;;  %p1901_p7 = por %p1900_p3, %p1899_p11 }
 0x4df   : > { %p1895_p12 = pneg %p1894_p9 }
 0x4e1   : > { %p1902_p10 = pnand %p1901_p7, %p1895_p12 }
 0x4e3   : > { %1905 = shalt.err (!%p1902_p10)
}
 0x4e4   : > { %s1906_s16 = scalar_lea.hbm %s2571_s5, 128 }
 0x4e5   : > { %p1907_p2 = scmp.ne.s32.totalorder %s2571_s5, %s1906_s16  ;;  %p1912_p4 = scmp.lt.u32.totalorder %s1906_s16, %s2571_s5 }
 0x4e7   : > { %p1908_p13 = pnand %p1907_p2, %p2594_p5 }
 0x4e9   : > { %p1909_p1 = pneg %p1908_p13 }
 0x4eb   : > { %p1914_p6 = pnand %p1912_p4, %p1909_p1 }
 0x4ed   : > { %1917 = shalt.err (!%p1914_p6)
}
 0x4ee   : > { %1597 = dma.vmem_to_hbm [thread:$0]  (%p2594_p5), %s1141_s10, 128, %s2571_s5, [#allocation14]  }
 0x4ef   : > { %1955 = dma.done.wait (%p2594_p5), [#allocation14], 128  }
 0x4f0   : > { %1957 = vsyncadd (%p2594_p5), [#allocation14], 4294967168 }
 0x4f1 PF: > { %p1628_p8 = scmp.ge.s32.totalorder %s1984_s23, 2  ;;  %s1156_s26 = sand.u32 1, %s1964_s18  }
 0x4f2   : > { %p2595_p0 = scmp.ne.s32.totalorder %s2582_s29, 0  ;;  %s1157_s28 = scalar_lea.sflag [#allocation6], %s1156_s26 }
 0x4f4   : > { %p1616_p9 = pnand %p1628_p8, %p2595_p0 }
 0x4f6   : > { %1959 = dma.done.wait (!%p1616_p9), %s1157_s28, 512  }
 0x4f7   : > { %1961 = vsyncadd (!%p1616_p9), %s1157_s28, 4294966784  ;;  %s25_s23 = sadd.s32 1, %s1984_s23   ;;  %s2596_s18 = smov %s1968_s19 }
 0x4f8   : > { %p22_p12 = scmp.ge.s32.totalorder %s25_s23, 5   ;;  %s2597_s19 = smov %s1972_s20 }
 0x4f9   : > { %s2598_s20 = smov %s2189_s6  ;;  %s2599_s21 = smov %s1980_s22 }
 0x4fa   : > { %s2600_s22 = smov %s2602_s15  ;;  %24 = sbr.rel (!%p22_p12) target bundleno = 9 (0x9), region = 118 }
 0x501   :  { %1162 = vsyncpa [#allocation5], 1 }
 0x502   :  { %1164 = vsyncpa [#allocation5 + $0x1], 1 }
 0x503   :  { %1165 = vsyncpa [#allocation8], 1 }
 0x504   :  { %1166 = vsyncpa [#allocation11], 1 }
 0x505   :  { %1167 = vsyncpa [#allocation6], 1 }
 0x506   :  { %1169 = vsyncpa [#allocation6 + $0x1], 1 }
 0x507   :  { %1170 = vsyncpa [#allocation14], 1 }

</bundles_post_ra>
